<compile_context>
chip_gen: v5e
topology: v5e:2x2
jax: 0.10.0
libtpu: 0.0.40
codegen_flags: <defaults>
</compile_context>

<pallas_src>
import jax
import jax.numpy as jnp
from jax import lax
from jax.experimental import pallas as pl
from jax.experimental.pallas import tpu as pltpu


IN_SPLITS = (128, 128, 67)        # (rdispph, prf, rwe) feature widths -> 323
IN_FEATURES = sum(IN_SPLITS)      # fixed by the reference nn.Linear(323, out_dim)
_LANE = 128
_SUBLANE = 8
_MAX_BATCH_TILE = 2048            # ~7.5 MB double-buffered -> fits v5e's 16 MiB scoped VMEM
_SINGLE_BLOCK_MAX_B = 256         # below this: one full-array block, no tiling
_MIN_PALLAS_BATCH_DEFAULT = 128   # below this a plain XLA dot is strictly faster


def _round_up(v, m):
    return ((v + m - 1) // m) * m


def _fused_concat_linear_kernel(x1_ref, x2_ref, x3_ref,
                                w1_ref, w2_ref, w3_ref, b_ref, o_ref):
    # Fused concat + Linear:  out = [x1 | x2 | x3] @ [w1; w2; w3] + b
    # precision=HIGHEST: numerically matches fp32 PyTorch closely; free here
    # because the kernel is HBM-bandwidth bound, not MXU bound.
    acc = jnp.dot(x1_ref[...], w1_ref[...],
                  preferred_element_type=jnp.float32,
                  precision=lax.Precision.HIGHEST)
    acc = acc + jnp.dot(x2_ref[...], w2_ref[...],
                        preferred_element_type=jnp.float32,
                        precision=lax.Precision.HIGHEST)
    acc = acc + jnp.dot(x3_ref[...], w3_ref[...],
                        preferred_element_type=jnp.float32,
                        precision=lax.Precision.HIGHEST)
    o_ref[...] = (acc + b_ref[...]).astype(o_ref.dtype)


def _pick_batch_tile(B):
    if B <= _SINGLE_BLOCK_MAX_B:
        # Single full-array block (block dims == full dims, so no (8,128)
        # divisibility requirement and no padding of the batch axis).
        return B
    # Guarantee >= 2 grid steps so the "parallel" batch axis can shard across
    # both v7x TensorCores; tile is a multiple of 8 and capped so the
    # double-buffered footprint stays well inside scoped VMEM everywhere.
    return min(_MAX_BATCH_TILE, _round_up(pl.cdiv(B, 2), _SUBLANE))


def fused_concat_linear(x1, x2, x3, w1, w2, w3, b_p, out_dim):
    """x_i: (B, k_i) f32, w_i: (k_i, Np) f32, b_p: (1, Np) f32 -> (B, out_dim)."""
    B = x1.shape[0]
    Np = w1.shape[1]
    k1, k2, k3 = w1.shape[0], w2.shape[0], w3.shape[0]
    K = k1 + k2 + k3

    tb = _pick_batch_tile(B)
    grid = (pl.cdiv(B, tb),)

    cost = pl.CostEstimate(
        flops=2 * B * K * Np,
        transcendentals=0,
        bytes_accessed=4 * (B * K + K * Np + B * Np + Np),
    )

    out_p = pl.pallas_call(
        _fused_concat_linear_kernel,
        out_shape=jax.ShapeDtypeStruct((B, Np), jnp.float32),
        grid=grid,
        in_specs=[
            pl.BlockSpec((tb, k1), lambda i: (i, 0)),
            pl.BlockSpec((tb, k2), lambda i: (i, 0)),
            pl.BlockSpec((tb, k3), lambda i: (i, 0)),   # K=67 tail: full-dims block
            pl.BlockSpec((k1, Np), lambda i: (0, 0)),   # weights stay VMEM-resident
            pl.BlockSpec((k2, Np), lambda i: (0, 0)),
            pl.BlockSpec((k3, Np), lambda i: (0, 0)),
            pl.BlockSpec((1, Np), lambda i: (0, 0)),
        ],
        out_specs=pl.BlockSpec((tb, Np), lambda i: (i, 0)),
        compiler_params=pltpu.CompilerParams(
            dimension_semantics=("parallel",),          # megacore-friendly (v7x)
        ),
        cost_estimate=cost,
    )(x1, x2, x3, w1, w2, w3, b_p)

    if Np == out_dim:
        return out_p
    # TODO(synk): a fused consumer could take the 128-padded buffer directly
    # and avoid this extra XLA copy on a memory-bound op.
    return out_p[:, :out_dim]


class LSTMPallas:
    """JAX/Pallas port of the reference PyTorch `LSTM` module's forward."""

    def __init__(self, hidden_dim, n_layers, out_dim, key,
                 in_splits=IN_SPLITS, min_pallas_batch=_MIN_PALLAS_BATCH_DEFAULT):
        # hidden_dim / n_layers are stored but unused in forward, matching the
        # reference module (its forward never builds an LSTM cell).
        self.hidden_dim = hidden_dim
        self.n_layers = n_layers
        self.out_dim = out_dim
        self.in_splits = tuple(in_splits)
        self.min_pallas_batch = min_pallas_batch
        assert sum(self.in_splits) == IN_FEATURES

        kw, kb = jax.random.split(key)
        # PyTorch nn.Linear default init: U(-1/sqrt(fan_in), 1/sqrt(fan_in))
        bound = 1.0 / (IN_FEATURES ** 0.5)
        self.weight = jax.random.uniform(
            kw, (out_dim, IN_FEATURES), jnp.float32, -bound, bound
        )
        self.bias = jax.random.uniform(
            kb, (out_dim,), jnp.float32, -bound, bound
        )

        # One-time preprocessing: transpose + pad N to a lane-dense multiple of
        # 128, split along K to match the three concat inputs, pad the bias.
        Np = _round_up(out_dim, _LANE)
        wt = jnp.zeros((IN_FEATURES, Np), jnp.float32).at[:, :out_dim].set(self.weight.T)
        s1, s2, _ = self.in_splits
        self.w1 = wt[:s1]
        self.w2 = wt[s1:s1 + s2]
        self.w3 = wt[s1 + s2:]
        self.b_p = jnp.zeros((1, Np), jnp.float32).at[0, :out_dim].set(self.bias)

    def _xla_forward(self, rdispph, prf, rwe):
        x = jnp.concatenate([rdispph, prf, rwe], axis=1)
        return jnp.dot(x, self.weight.T,
                       precision=lax.Precision.HIGHEST) + self.bias

    def __call__(self, rdispph, prf, rwe):
        # torch.cat(..., 1).unsqueeze(2).squeeze() == plain concat for B > 1;
        # the concat is fused into the kernel as three MXU dots.
        # TODO(synk): for B == 1 the reference .squeeze() also drops the batch
        # dim; this port keeps (B, out_dim) and assumes B > 1.
        assert rdispph.shape[1] == self.in_splits[0]
        assert prf.shape[1] == self.in_splits[1]
        assert rwe.shape[1] == self.in_splits[2]
        B = rdispph.shape[0]
        if B < self.min_pallas_batch:
            # Latency-bound regime: custom-call + DMA setup dominates, MXU
            # M-dim is nearly empty -> a fused XLA dot is strictly faster.
            return self._xla_forward(rdispph, prf, rwe)
        return fused_concat_linear(rdispph, prf, rwe,
                                   self.w1, self.w2, self.w3,
                                   self.b_p, self.out_dim)


if __name__ == "__main__":
    key = jax.random.PRNGKey(0)
    k1, k2, k3, k4, kparams = jax.random.split(key, 5)

    out_dim = 32
    f1, f2, f3 = IN_SPLITS  # must sum to 323 (module hard-codes Linear(323, ...))

    # min_pallas_batch=0 so even the tiny test batch exercises the Pallas path.
    model = LSTMPallas(hidden_dim=64, n_layers=2, out_dim=out_dim, key=kparams,
                       min_pallas_batch=0)

    # --- case 1: small batch, single full-array block ---
    batch = 2
    rdispph = jax.random.normal(k1, (batch, f1), jnp.float32)
    prf = jax.random.normal(k2, (batch, f2), jnp.float32)
    rwe = jax.random.normal(k3, (batch, f3), jnp.float32)

    out = jax.block_until_ready(model(rdispph, prf, rwe))
    x_ref = jnp.concatenate([rdispph, prf, rwe], axis=1)
    ref = jnp.dot(x_ref, model.weight.T, precision=lax.Precision.HIGHEST) + model.bias
    assert out.shape == (batch, out_dim)
    assert jnp.allclose(out, ref, atol=1e-4, rtol=1e-4)

    # --- case 2: tiled batch grid (>=2 steps, partial last block) ---
    batch2 = 399
    kk1, kk2, kk3 = jax.random.split(k4, 3)
    rdispph2 = jax.random.normal(kk1, (batch2, f1), jnp.float32)
    prf2 = jax.random.normal(kk2, (batch2, f2), jnp.float32)
    rwe2 = jax.random.normal(kk3, (batch2, f3), jnp.float32)

    out2 = jax.block_until_ready(model(rdispph2, prf2, rwe2))
    x_ref2 = jnp.concatenate([rdispph2, prf2, rwe2], axis=1)
    ref2 = jnp.dot(x_ref2, model.weight.T, precision=lax.Precision.HIGHEST) + model.bias
    assert out2.shape == (batch2, out_dim)
    assert jnp.allclose(out2, ref2, atol=1e-4, rtol=1e-4)

    print("KERNEL_OK")
</pallas_src>

<mosaic_0001>
module attributes {stable_mosaic.version = 11 : i64} {
  func.func @_fused_concat_linear_kernel(%arg0: i32, %arg1: memref<2x128xf32, #tpu.memory_space<vmem>>, %arg2: memref<2x128xf32, #tpu.memory_space<vmem>>, %arg3: memref<2x67xf32, #tpu.memory_space<vmem>>, %arg4: memref<128x128xf32, #tpu.memory_space<vmem>>, %arg5: memref<128x128xf32, #tpu.memory_space<vmem>>, %arg6: memref<67x128xf32, #tpu.memory_space<vmem>>, %arg7: memref<1x128xf32, #tpu.memory_space<vmem>>, %arg8: memref<2x128xf32, #tpu.memory_space<vmem>>) attributes {dimension_semantics = [#tpu.dimension_semantics<parallel>], iteration_bounds = array<i64: 1>, scalar_prefetch = 0 : i64, scratch_operands = 0 : i64, tpu.core_type = #tpu.core_type<tc>, window_params = [{transform_indices = @transform_0, window_bounds = array<i64: 2, 128>}, {transform_indices = @transform_1, window_bounds = array<i64: 2, 128>}, {transform_indices = @transform_2, window_bounds = array<i64: 2, 67>}, {pipeline_mode = #tpu.pipeline_mode<synchronous>, transform_indices = @transform_3, window_bounds = array<i64: 128, 128>}, {pipeline_mode = #tpu.pipeline_mode<synchronous>, transform_indices = @transform_4, window_bounds = array<i64: 128, 128>}, {pipeline_mode = #tpu.pipeline_mode<synchronous>, transform_indices = @transform_5, window_bounds = array<i64: 67, 128>}, {pipeline_mode = #tpu.pipeline_mode<synchronous>, transform_indices = @transform_6, window_bounds = array<i64: 1, 128>}, {transform_indices = @transform_7, window_bounds = array<i64: 2, 128>}]} {
    %c0 = arith.constant 0 : index
    %c0_0 = arith.constant 0 : index
    %0 = vector.load %arg1[%c0, %c0_0] : memref<2x128xf32, #tpu.memory_space<vmem>>, vector<2x128xf32>
    %c0_1 = arith.constant 0 : index
    %c0_2 = arith.constant 0 : index
    %1 = vector.load %arg4[%c0_1, %c0_2] : memref<128x128xf32, #tpu.memory_space<vmem>>, vector<128x128xf32>
    %cst = arith.constant dense<0.000000e+00> : vector<2x128xf32>
    %2 = tpu.matmul %0, %1, %cst {dimension_numbers = #tpu.dot_dimension_numbers<[1], [0], [0], [1], [0, 0, 1, 1], [], []>, precision = #tpu.contract_precision<fp32>} : vector<2x128xf32>, vector<128x128xf32>, vector<2x128xf32> -> vector<2x128xf32>
    %c0_3 = arith.constant 0 : index
    %c0_4 = arith.constant 0 : index
    %3 = vector.load %arg2[%c0_3, %c0_4] : memref<2x128xf32, #tpu.memory_space<vmem>>, vector<2x128xf32>
    %c0_5 = arith.constant 0 : index
    %c0_6 = arith.constant 0 : index
    %4 = vector.load %arg5[%c0_5, %c0_6] : memref<128x128xf32, #tpu.memory_space<vmem>>, vector<128x128xf32>
    %cst_7 = arith.constant dense<0.000000e+00> : vector<2x128xf32>
    %5 = tpu.matmul %3, %4, %cst_7 {dimension_numbers = #tpu.dot_dimension_numbers<[1], [0], [0], [1], [0, 0, 1, 1], [], []>, precision = #tpu.contract_precision<fp32>} : vector<2x128xf32>, vector<128x128xf32>, vector<2x128xf32> -> vector<2x128xf32>
    %6 = arith.addf %2, %5 : vector<2x128xf32>
    %c0_8 = arith.constant 0 : index
    %c0_9 = arith.constant 0 : index
    %7 = vector.load %arg3[%c0_8, %c0_9] : memref<2x67xf32, #tpu.memory_space<vmem>>, vector<2x67xf32>
    %c0_10 = arith.constant 0 : index
    %c0_11 = arith.constant 0 : index
    %8 = vector.load %arg6[%c0_10, %c0_11] : memref<67x128xf32, #tpu.memory_space<vmem>>, vector<67x128xf32>
    %cst_12 = arith.constant dense<0.000000e+00> : vector<2x128xf32>
    %9 = tpu.matmul %7, %8, %cst_12 {dimension_numbers = #tpu.dot_dimension_numbers<[1], [0], [0], [1], [0, 0, 1, 1], [], []>, precision = #tpu.contract_precision<fp32>} : vector<2x67xf32>, vector<67x128xf32>, vector<2x128xf32> -> vector<2x128xf32>
    %10 = arith.addf %6, %9 : vector<2x128xf32>
    %c0_13 = arith.constant 0 : index
    %c0_14 = arith.constant 0 : index
    %11 = vector.load %arg7[%c0_13, %c0_14] : memref<1x128xf32, #tpu.memory_space<vmem>>, vector<1x128xf32>
    %12 = vector.broadcast %11 : vector<1x128xf32> to vector<2x128xf32>
    %13 = arith.addf %10, %12 : vector<2x128xf32>
    %c0_15 = arith.constant 0 : index
    %c0_16 = arith.constant 0 : index
    %14 = vector.load %arg8[%c0_15, %c0_16] : memref<2x128xf32, #tpu.memory_space<vmem>>, vector<2x128xf32>
    tpu.vector_store %arg8[%c0_15, %c0_16], %13 {strides = array<i32>} : memref<2x128xf32, #tpu.memory_space<vmem>>, vector<2x128xf32>,
    return
  }
  func.func @transform_0(%arg0: i32) -> (i32, i32) {
    %c0_i32 = arith.constant 0 : i32
    %c0_i32_0 = arith.constant 0 : i32
    return %arg0, %c0_i32 : i32, i32
  }
  func.func @transform_1(%arg0: i32) -> (i32, i32) {
    %c0_i32 = arith.constant 0 : i32
    %c0_i32_0 = arith.constant 0 : i32
    return %arg0, %c0_i32 : i32, i32
  }
  func.func @transform_2(%arg0: i32) -> (i32, i32) {
    %c0_i32 = arith.constant 0 : i32
    %c0_i32_0 = arith.constant 0 : i32
    return %arg0, %c0_i32 : i32, i32
  }
  func.func @transform_3(%arg0: i32) -> (i32, i32) {
    %c0_i32 = arith.constant 0 : i32
    %c0_i32_0 = arith.constant 0 : i32
    %c0_i32_1 = arith.constant 0 : i32
    return %c0_i32, %c0_i32_0 : i32, i32
  }
  func.func @transform_4(%arg0: i32) -> (i32, i32) {
    %c0_i32 = arith.constant 0 : i32
    %c0_i32_0 = arith.constant 0 : i32
    %c0_i32_1 = arith.constant 0 : i32
    return %c0_i32, %c0_i32_0 : i32, i32
  }
  func.func @transform_5(%arg0: i32) -> (i32, i32) {
    %c0_i32 = arith.constant 0 : i32
    %c0_i32_0 = arith.constant 0 : i32
    %c0_i32_1 = arith.constant 0 : i32
    return %c0_i32, %c0_i32_0 : i32, i32
  }
  func.func @transform_6(%arg0: i32) -> (i32, i32) {
    %c0_i32 = arith.constant 0 : i32
    %c0_i32_0 = arith.constant 0 : i32
    %c0_i32_1 = arith.constant 0 : i32
    return %c0_i32, %c0_i32_0 : i32, i32
  }
  func.func @transform_7(%arg0: i32) -> (i32, i32) {
    %c0_i32 = arith.constant 0 : i32
    %c0_i32_0 = arith.constant 0 : i32
    return %arg0, %c0_i32 : i32, i32
  }
}

</mosaic_0001>

<bundles_post_ra>
// kernel: tpu_custom_call.1
= control target key start
LH: loop header
LB: loop body
LE: loop exit
PB: predicated region body
PF: predicated region fallthrough
CT: control target
= control target key end

     0   :  { %12 = vsyncpa [#allocation3], 0  ;;  %s2026_s0 = inlined_call_operand.hbm [shape: f32[2,128], index: 0, kind: input, shape index: {}]   ;;  %s2027_s1 = inlined_call_operand.hbm [shape: f32[2,128], index: 1, kind: input, shape index: {}]   ;;  %s2028_s2 = inlined_call_operand.hbm [shape: f32[2,67], index: 2, kind: input, shape index: {}]   ;;  %s2029_s3 = inlined_call_operand.hbm [shape: f32[128,128], index: 3, kind: input, shape index: {}]   ;;  %s2030_s4 = inlined_call_operand.hbm [shape: f32[128,128], index: 4, kind: input, shape index: {}]   ;;  %s2031_s5 = inlined_call_operand.hbm [shape: f32[67,128], index: 5, kind: input, shape index: {}]   ;;  %s2032_s6 = inlined_call_operand.vmem [shape: f32[1,128], index: 6, kind: input, shape index: {}]   ;;  %s2033_s7 = inlined_call_operand.hbm [shape: f32[2,128], index: 7, kind: output, shape index: {}]  }
   0x1   :  { %13 = vsyncpa [#allocation6], 0 }
   0x2   :  { %14 = vsyncpa [#allocation9], 0 }
   0x3   :  { %15 = vsyncpa [#allocation12], 0  ;;  %s33_s26 = sshll.u32 %s2027_s1, 4  ;;  %s34_s26 = int_to_ptr.hbm [resolvable:$true] %s33_s26 }
   0x4   :  { %16 = vsyncpa [#allocation4], 0  ;;  %s1314_s27 = smov [#allocation5]   ;;  %s54_s8 = sshll.u32 %s2029_s3, 4  ;;  %s55_s8 = int_to_ptr.hbm [resolvable:$true] %s54_s8 }
   0x5   :  { %s35_s28 = sshll.u32 %s1314_s27, 4  ;;  %s1315_s9 = smov [#allocation8]   ;;  %s36_s28 = int_to_ptr.vmem [resolvable:$true] %s35_s28 }
   0x6   :  { %38 = dma.hbm_to_vmem [thread:$0]  %s34_s26, 32, %s36_s28, [#allocation6]  }
   0x7   :  { %s56_s10 = sshll.u32 %s1315_s9, 4  ;;  %s1316_s11 = smov 128   ;;  %s57_s10 = int_to_ptr.vmem [resolvable:$true] %s56_s10 }
   0x8   :  { %s1317_s12 = smov 8   ;;  %s22_s1 = sshll.u32 %s2026_s0, 4  ;;  %s23_s1 = int_to_ptr.hbm [resolvable:$true] %s22_s1 }
   0x9   :  { %62 = dma.hbm_to_vmem [thread:$0]  %s55_s8, 2048, %s57_s10, [#allocation9], %s1316_s11, %s1316_s11, %s1317_s12  }
   0xa   :  { %s1318_s15 = smov [#allocation2]   ;;  %s44_s3 = sshll.u32 %s2028_s2, 4  ;;  %s45_s3 = int_to_ptr.hbm [resolvable:$true] %s44_s3 }
   0xb   :  { %s24_s16 = sshll.u32 %s1318_s15, 4  ;;  %s1319_s19 = smov [#allocation7]   ;;  %s25_s16 = int_to_ptr.vmem [resolvable:$true] %s24_s16 }
   0xc   :  { %27 = dma.hbm_to_vmem [thread:$0]  %s23_s1, 32, %s25_s16, [#allocation3]  }
   0xd   :  { %s46_s20 = sshll.u32 %s1319_s19, 4  ;;  %s67_s23 = sshll.u32 %s2030_s4, 4  ;;  %s47_s20 = int_to_ptr.vmem [resolvable:$true] %s46_s20  ;;  %s68_s23 = int_to_ptr.hbm [resolvable:$true] %s67_s23 }
   0xe   :  { %49 = dma.hbm_to_vmem [thread:$0]  %s45_s3, 32, %s47_s20, [#allocation6]  }
   0xf   :  { %s80_s25 = sshll.u32 %s2031_s5, 4  ;;  %s1320_s26 = smov [#allocation10]   ;;  %s81_s25 = int_to_ptr.hbm [resolvable:$true] %s80_s25 }
  0x10   :  { %s69_s27 = sshll.u32 %s1320_s26, 4  ;;  %s1321_s2 = smov [#allocation11]   ;;  %s70_s27 = int_to_ptr.vmem [resolvable:$true] %s69_s27 }
  0x11   :  { %75 = dma.hbm_to_vmem [thread:$0]  %s68_s23, 2048, %s70_s27, [#allocation9], %s1316_s11, %s1316_s11, %s1317_s12  }
  0x12   :  { %s82_s28 = sshll.u32 %s1321_s2, 4  ;;  %s83_s28 = int_to_ptr.vmem [resolvable:$true] %s82_s28 }
  0x13   :  { %88 = dma.hbm_to_vmem [thread:$0]  %s81_s25, 1152, %s83_s28, [#allocation12], %s1316_s11, %s1316_s11, %s1317_s12  }
  0x14   :  { %1304 = dma.done.wait [#allocation3], 32  }
  0x15   :  { %1305 = vsyncadd [#allocation3], 4294967264 }
  0x16   :  { %1306 = dma.done.wait [#allocation6], 64  }
  0x17   :  { %1307 = vsyncadd [#allocation6], 4294967232 }
  0x18   :  { %1308 = dma.done.wait [#allocation9], 4096  }
  0x19   :  { %1309 = vsyncadd [#allocation9], 4294963200 }
  0x1a   :  { %1310 = dma.done.wait [#allocation12], 1152  }
  0x1b   :  { %1311 = vsyncadd [#allocation12], 4294966144  ;;  %v148_v0 = vld [vmem:[#allocation10 + $0x78] sm:$0xff]  ;;  %v147_v1 = vld [vmem:[#allocation10 + $0x70] sm:$0xff]  ;;  %vm845_vm0 = vcmask 1042432   ;;  %vm841_vm1 = vcmask 547840  }
  0x1c   :  { %v146_v2 = vld [vmem:[#allocation10 + $0x68] sm:$0xff]  ;;  %v1381_v3 = vand.u32 4294901760, %v148_v0  ;;  %v1383_v4 = vand.u32 4294901760, %v147_v1  ;;  %v145_v6 = vld [vmem:[#allocation10 + $0x60] sm:$0xff]  ;;  %v144_v7 = vld [vmem:[#allocation10 + $0x58] sm:$0xff]  ;;  %s1322_s29 = smov [#allocation13]  }
  0x1d   :  { %v1385_v5 = vand.u32 4294901760, %v146_v2  ;;  %v143_v8 = vld [vmem:[#allocation10 + $0x50] sm:$0xff]  ;;  %v1387_v9 = vand.u32 4294901760, %v145_v6  ;;  %v1389_v10 = vand.u32 4294901760, %v144_v7  ;;  %v142_v12 = vld [vmem:[#allocation10 + $0x48] sm:$0xff]  ;;  %v141_v13 = vld [vmem:[#allocation10 + $0x40] sm:$0xff] }
  0x1e   :  { %v1391_v11 = vand.u32 4294901760, %v143_v8  ;;  %150 = vmatpush.msra.mxu0 %v1381_v3  ;;  %v1395_v14 = vsub.f32 %v148_v0, %v1381_v3  ;;  %v1398_v15 = vsub.f32 %v147_v1, %v1383_v4  ;;  %346 = vmatpush.msra.mxu3 %v1381_v3  ;;  %v1404_v17 = vand.u32 4294901760, %v142_v12  ;;  %v140_v18 = vld [vmem:[#allocation10 + $0x38] sm:$0xff]  ;;  %v139_v26 = vld [vmem:[#allocation10 + $0x30] sm:$0xff]  ;;  %v138_v34 = vld [vmem:[#allocation10 + $0x28] sm:$0xff]  ;;  %s1111_s30 = sshll.u32 %s1322_s29, 4  ;;  %s1112_s30 = int_to_ptr.vmem [resolvable:$true] %s1111_s30 }
  0x1f   :  { %v1402_v16 = vsub.f32 %v146_v2, %v1385_v5  ;;  %v1407_v19 = vsub.f32 %v145_v6, %v1387_v9  ;;  %v1410_v20 = vsub.f32 %v144_v7, %v1389_v10  ;;  %v1420_v25 = vand.u32 4294901760, %v141_v13  ;;  %v137_v42 = vld [vmem:[#allocation10 + $0x20] sm:$0xff]  ;;  %v136_v48 = vld [vmem:[#allocation10 + $0x18] sm:$0xff]  ;;  %v135_v54 = vld [vmem:[#allocation10 + $0x10] sm:$0xff]  ;;  %s1113_s10 = sshll.u32 %s2033_s7, 4  ;;  %s1114_s10 = int_to_ptr.hbm [resolvable:$true] %s1113_s10 }
  0x20   :  { %v1413_v21 = vsub.f32 %v143_v8, %v1391_v11  ;;  %152 = vmatpush.msra.mxu0 %v1383_v4  ;;  %293 = vmatpush.msra.mxu2 %v1395_v14  ;;  %v192_v22 = vand.u32 4294901760, %v1395_v14  ;;  %v2049_v23 = vand.u32 4294901760, %v1398_v15  ;;  %v1424_v28 = vand.u32 4294901760, %v140_v18  ;;  %v131_v59 = vld [vmem:[#allocation8 + $0x78] sm:$0xff]  ;;  %v134_v61 = vld [vmem:[#allocation10 + $0x8] sm:$0xff]  ;;  %v133_v2 = vld [vmem:[#allocation10] sm:$0xff] }
  0x21   :  { %v2047_v24 = vand.u32 4294901760, %v1402_v16  ;;  %348 = vmatpush.msra.mxu3 %v1383_v4  ;;  %v2045_v27 = vand.u32 4294901760, %v1407_v19  ;;  %v1427_v29 = vsub.f32 %v142_v12, %v1404_v17  ;;  %v2043_v33 = vand.u32 4294901760, %v1410_v20  ;;  %v130_v6 = vld [vmem:[#allocation8 + $0x70] sm:$0xff] }
  0x22   :  { %154 = vmatpush.msra.mxu0 %v1385_v5  ;;  %296 = vmatpush.msra.mxu2 %v1398_v15  ;;  %v193_v30 = vsub.f32 %v1395_v14, %v192_v22  ;;  %v199_v31 = vsub.f32 %v1398_v15, %v2049_v23  ;;  %v1442_v35 = vand.u32 4294901760, %v139_v26  ;;  %v2041_v36 = vand.u32 4294901760, %v1413_v21 }
  0x23   :  { %v205_v32 = vsub.f32 %v1402_v16, %v2047_v24  ;;  %350 = vmatpush.msra.mxu3 %v1385_v5  ;;  %v211_v39 = vsub.f32 %v1407_v19, %v2045_v27  ;;  %v1451_v40 = vsub.f32 %v141_v13, %v1420_v25  ;;  %v1454_v41 = vand.u32 4294901760, %v138_v34 }
  0x24   :  { %156 = vmatpush.msra.mxu0 %v1387_v9  ;;  %v194_v37 = vand.u32 4294901760, %v193_v30  ;;  %299 = vmatpush.msra.mxu2 %v1402_v16  ;;  %v200_v38 = vand.u32 4294901760, %v199_v31  ;;  %v217_v44 = vsub.f32 %v1410_v20, %v2043_v33  ;;  %v2040_v45 = vand.u32 4294901760, %v1427_v29 }
  0x25   :  { %352 = vmatpush.msra.mxu3 %v1387_v9  ;;  %v206_v43 = vand.u32 4294901760, %v205_v32  ;;  %v1462_v46 = vsub.f32 %v140_v18, %v1424_v28  ;;  %v223_v47 = vsub.f32 %v1413_v21, %v2041_v36  ;;  %v212_v49 = vand.u32 4294901760, %v211_v39  ;;  %v129_v32 = vld [vmem:[#allocation8 + $0x68] sm:$0xff] }
  0x26   :  { %158 = vmatpush.msra.mxu0 %v1389_v10  ;;  %195 = vmatpush.msra.mxu1 %v194_v37  ;;  %v1470_v50 = vand.u32 4294901760, %v137_v42  ;;  %v2039_v51 = vand.u32 4294901760, %v1451_v40  ;;  %v1474_v52 = vsub.f32 %v139_v26, %v1442_v35  ;;  %v1479_v53 = vsub.f32 %v138_v34, %v1454_v41 }
  0x27   :  { %302 = vmatpush.msra.mxu2 %v1407_v19  ;;  %354 = vmatpush.msra.mxu3 %v1389_v10  ;;  %v218_v55 = vand.u32 4294901760, %v217_v44  ;;  %v229_v56 = vsub.f32 %v1427_v29, %v2040_v45  ;;  %v1485_v57 = vand.u32 4294901760, %v136_v48  ;;  %v2038_v58 = vand.u32 4294901760, %v1462_v46  ;;  %v128_v44 = vld [vmem:[#allocation8 + $0x60] sm:$0xff] }
  0x28   :  { %160 = vmatpush.msra.mxu0 %v1391_v11  ;;  %201 = vmatpush.msra.mxu1 %v200_v38  ;;  %v224_v60 = vand.u32 4294901760, %v223_v47  ;;  %v235_v62 = vsub.f32 %v1451_v40, %v2039_v51  ;;  %v1494_v63 = vand.u32 4294901760, %v135_v54  ;;  %v2036_v0 = vand.u32 4294901760, %v1474_v52  ;;  %v124_v45 = vld [vmem:[#allocation8 + $0x40] sm:$0xff] }
  0x29   :  { %305 = vmatpush.msra.mxu2 %v1410_v20  ;;  %356 = vmatpush.msra.mxu3 %v1391_v11  ;;  %v1498_v1 = vsub.f32 %v137_v42, %v1470_v50  ;;  %v2035_v7 = vand.u32 4294901760, %v1479_v53  ;;  %v1503_v8 = vand.u32 4294901760, %v131_v59  ;;  %v230_v12 = vand.u32 4294901760, %v229_v56 }
  0x2a   :  { %162 = vmatpush.msra.mxu0 %v1404_v17  ;;  %207 = vmatpush.msra.mxu1 %v206_v43  ;;  %v241_v13 = vsub.f32 %v1462_v46, %v2038_v58  ;;  %v1509_v18 = vand.u32 4294901760, %v134_v61  ;;  %v1512_v26 = vsub.f32 %v136_v48, %v1485_v57  ;;  %v1516_v30 = vand.u32 4294901760, %v133_v2 }
  0x2b   :  { %308 = vmatpush.msra.mxu2 %v1413_v21  ;;  %358 = vmatpush.msra.mxu3 %v1404_v17  ;;  %v1518_v31 = vand.u32 4294901760, %v130_v6  ;;  %v236_v34 = vand.u32 4294901760, %v235_v62  ;;  %v247_v37 = vsub.f32 %v1474_v52, %v2036_v0  ;;  %v2034_v38 = vand.u32 4294901760, %v1498_v1 }
  0x2c   :  { %164 = vmatpush.msra.mxu0 %v1420_v25  ;;  %213 = vmatpush.msra.mxu1 %v212_v49  ;;  %2053 = vst [vmem:[#allocation19_spill] sm:$0xff] %v1516_v30  ;;  %v1526_v39 = vsub.f32 %v135_v54, %v1494_v63  ;;  %v253_v42 = vsub.f32 %v1479_v53, %v2035_v7  ;;  %v242_v47 = vand.u32 4294901760, %v241_v13  ;;  %v2037_v48 = vand.u32 4294901760, %v1512_v26  ;;  %v126_v13 = vld [vmem:[#allocation8 + $0x50] sm:$0xff] }
  0x2d   :  { %311 = vmatpush.msra.mxu2 %v1427_v29  ;;  %360 = vmatpush.msra.mxu3 %v1420_v25  ;;  %v1534_v43 = vsub.f32 %v131_v59, %v1503_v8  ;;  %v1539_v49 = vsub.f32 %v134_v61, %v1509_v18  ;;  %v1541_v54 = vand.u32 4294901760, %v129_v32  ;;  %v1549_v56 = vsub.f32 %v130_v6, %v1518_v31  ;;  %v127_v59 = vld [vmem:[#allocation8 + $0x58] sm:$0xff] }
  0x2e   :  { %166 = vmatpush.msra.mxu0 %v1424_v28  ;;  %219 = vmatpush.msra.mxu1 %v218_v55  ;;  %v1546_v55 = vsub.f32 %v133_v2, %v1516_v30  ;;  %v259_v61 = vsub.f32 %v1498_v1, %v2034_v38  ;;  %v2042_v62 = vand.u32 4294901760, %v1526_v39  ;;  %v254_v2 = vand.u32 4294901760, %v253_v42  ;;  %v125_v42 = vld [vmem:[#allocation8 + $0x48] sm:$0xff] }
  0x2f   :  { %314 = vmatpush.msra.mxu2 %v1451_v40  ;;  %362 = vmatpush.msra.mxu3 %v1424_v28  ;;  %v2044_v6 = vand.u32 4294901760, %v1534_v43  ;;  %v1567_v38 = vsub.f32 %v129_v32, %v1541_v54  ;;  %v1569_v7 = vand.u32 4294901760, %v127_v59  ;;  %v1582_v51 = vand.u32 4294901760, %v126_v13 }
  0x30   :  { %168 = vmatpush.msra.mxu0 %v1442_v35  ;;  %225 = vmatpush.msra.mxu1 %v224_v60  ;;  %v248_v60 = vand.u32 4294901760, %v247_v37  ;;  %v2046_v37 = vand.u32 4294901760, %v1539_v49  ;;  %v2050_v0 = vand.u32 4294901760, %v1546_v55  ;;  %v271_v32 = vsub.f32 %v1526_v39, %v2042_v62 }
  0x31   :  { %317 = vmatpush.msra.mxu2 %v1462_v46  ;;  %364 = vmatpush.msra.mxu3 %v1442_v35  ;;  %v534_v36 = vsub.f32 %v1534_v43, %v2044_v6  ;;  %v2051_v62 = vand.u32 4294901760, %v1567_v38  ;;  %v1597_v33 = vsub.f32 %v127_v59, %v1569_v7  ;;  %v1604_v27 = vand.u32 4294901760, %v124_v45 }
  0x32   :  { %170 = vmatpush.msra.mxu0 %v1454_v41  ;;  %231 = vmatpush.msra.mxu1 %v230_v12  ;;  %v1556_v12 = vand.u32 4294901760, %v128_v44  ;;  %v283_v59 = vsub.f32 %v1546_v55, %v2050_v0  ;;  %v1612_v24 = vsub.f32 %v126_v13, %v1582_v51  ;;  %v2054_v14 = vand.u32 4294901760, %v1398_v15 }
  0x33   :  { %320 = vmatpush.msra.mxu2 %v1474_v52  ;;  %366 = vmatpush.msra.mxu3 %v1454_v41  ;;  %v546_v0 = vsub.f32 %v1567_v38, %v2051_v62  ;;  %v2056_v15 = vand.u32 4294901760, %v1402_v16  ;;  %v2058_v16 = vand.u32 4294901760, %v1407_v19  ;;  %v2060_v19 = vand.u32 4294901760, %v1410_v20 }
  0x34   :  { %172 = vmatpush.msra.mxu0 %v1470_v50  ;;  %237 = vmatpush.msra.mxu1 %v236_v34  ;;  %v265_v34 = vsub.f32 %v1512_v26, %v2037_v48  ;;  %v260_v48 = vand.u32 4294901760, %v259_v61  ;;  %v1580_v58 = vsub.f32 %v128_v44, %v1556_v12  ;;  %v277_v44 = vsub.f32 %v1539_v49, %v2046_v37 }
  0x35   :  { %323 = vmatpush.msra.mxu2 %v1479_v53  ;;  %368 = vmatpush.msra.mxu3 %v1470_v50  ;;  %v2062_v20 = vand.u32 4294901760, %v1413_v21  ;;  %v2064_v21 = vand.u32 4294901760, %v1427_v29  ;;  %v2066_v29 = vand.u32 4294901760, %v1451_v40  ;;  %v2068_v40 = vand.u32 4294901760, %v1462_v46 }
  0x36   :  { %174 = vmatpush.msra.mxu0 %v1485_v57  ;;  %243 = vmatpush.msra.mxu1 %v242_v47  ;;  %v2048_v47 = vand.u32 4294901760, %v1549_v56  ;;  %v266_v61 = vand.u32 4294901760, %v265_v34  ;;  %v272_v34 = vand.u32 4294901760, %v271_v32  ;;  %v278_v32 = vand.u32 4294901760, %v277_v44 }
  0x37   :  { %326 = vmatpush.msra.mxu2 %v1498_v1  ;;  %370 = vmatpush.msra.mxu3 %v1485_v57  ;;  %v2055_v44 = vand.u32 4294901760, %v1580_v58 }
  0x38   :  { %176 = vmatpush.msra.mxu0 %v1494_v63  ;;  %249 = vmatpush.msra.mxu1 %v248_v60  ;;  %v1589_v60 = vand.u32 4294901760, %v125_v42  ;;  %v540_v6 = vsub.f32 %v1549_v56, %v2048_v47  ;;  %v535_v47 = vand.u32 4294901760, %v534_v36  ;;  %v1631_v36 = vsub.f32 %v124_v45, %v1604_v27 }
  0x39   :  { %329 = vmatpush.msra.mxu2 %v1512_v26  ;;  %372 = vmatpush.msra.mxu3 %v1494_v63  ;;  %v552_v62 = vsub.f32 %v1580_v58, %v2055_v44 }
  0x3a   :  { %178 = vmatpush.msra.mxu0 %v1509_v18  ;;  %255 = vmatpush.msra.mxu1 %v254_v2  ;;  %v123_v2 = vld [vmem:[#allocation8 + $0x38] sm:$0xff]  ;;  %v1618_v23 = vsub.f32 %v125_v42, %v1589_v60  ;;  %v121_v42 = vld [vmem:[#allocation8 + $0x28] sm:$0xff] }
  0x3b   :  { %332 = vmatpush.msra.mxu2 %v1526_v39  ;;  %374 = vmatpush.msra.mxu3 %v1509_v18  ;;  %v1625_v37 = vand.u32 4294901760, %v123_v2  ;;  %v1650_v13 = vand.u32 4294901760, %v121_v42 }
  0x3c   :  { %180 = vmatpush.msra.mxu0 %v1516_v30  ;;  %261 = vmatpush.msra.mxu1 %v260_v48  ;;  %v122_v48 = vld [vmem:[#allocation8 + $0x30] sm:$0xff] }
  0x3d   :  { %335 = vmatpush.msra.mxu2 %v1539_v49  ;;  %376 = vmatpush.msra.mxu3 %v1516_v30  ;;  %v1638_v30 = vand.u32 4294901760, %v122_v48  ;;  %v1648_v44 = vsub.f32 %v123_v2, %v1625_v37 }
  0x3e   :  { %387 = vmatpush.msrb.mxu0 %v192_v22  ;;  %267 = vmatpush.msra.mxu1 %v266_v61  ;;  %v541_v22 = vand.u32 4294901760, %v540_v6  ;;  %v284_v61 = vand.u32 4294901760, %v283_v59  ;;  %v120_v6 = vld [vmem:[#allocation8 + $0x20] sm:$0xff]  ;;  %v2057_v59 = vand.u32 4294901760, %v1597_v33 }
  0x3f   :  { %338 = vmatpush.msra.mxu2 %v1546_v55  ;;  %536 = vmatpush.msrb.mxu3 %v535_v47  ;;  %v1660_v2 = vsub.f32 %v122_v48, %v1638_v30  ;;  %v1662_v45 = vand.u32 4294901760, %v120_v6  ;;  %v1673_v48 = vsub.f32 %v121_v42, %v1650_v13 }
  0x40   :  { %391 = vmatpush.msrb.mxu0 %v2054_v14  ;;  %273 = vmatpush.msra.mxu1 %v272_v34  ;;  %v547_v34 = vand.u32 4294901760, %v546_v0  ;;  %v558_v14 = vsub.f32 %v1597_v33, %v2057_v59  ;;  %v553_v0 = vand.u32 4294901760, %v552_v62 }
  0x41   :  { %491 = vmatpush.msrb.mxu2 %v1503_v8  ;;  %542 = vmatpush.msrb.mxu3 %v541_v22  ;;  %v2061_v22 = vand.u32 4294901760, %v1618_v23  ;;  %v1686_v42 = vsub.f32 %v120_v6, %v1662_v45 }
  0x42   :  { %395 = vmatpush.msrb.mxu0 %v2056_v15  ;;  %279 = vmatpush.msra.mxu1 %v278_v32  ;;  %v119_v15 = vld [vmem:[#allocation8 + $0x18] sm:$0xff]  ;;  %v2059_v32 = vand.u32 4294901760, %v1612_v24  ;;  %v559_v62 = vand.u32 4294901760, %v558_v14 }
  0x43   :  { %493 = vmatpush.msrb.mxu2 %v1518_v31  ;;  %548 = vmatpush.msrb.mxu3 %v547_v34  ;;  %v1675_v47 = vand.u32 4294901760, %v119_v15 }
  0x44   :  { %399 = vmatpush.msrb.mxu0 %v2058_v16  ;;  %285 = vmatpush.msra.mxu1 %v284_v61  ;;  %v564_v59 = vsub.f32 %v1612_v24, %v2059_v32  ;;  %v570_v61 = vsub.f32 %v1618_v23, %v2061_v22  ;;  %v132_v16 = vld [vmem:[#allocation5] sm:$0x3]  ;;  %v118_v22 = vld [vmem:[#allocation8 + $0x10] sm:$0xff] }
  0x45   :  { %495 = vmatpush.msrb.mxu2 %v1541_v54  ;;  %554 = vmatpush.msrb.mxu3 %v553_v0  ;;  %v1688_v32 = vand.u32 4294901760, %v132_v16  ;;  %v2065_v0 = vand.u32 4294901760, %v1648_v44  ;;  %v1698_v6 = vand.u32 4294901760, %v118_v22  ;;  %v1701_v14 = vsub.f32 %v119_v15, %v1675_v47 }
  0x46   :  { %403 = vmatpush.msrb.mxu0 %v2060_v19  ;;  %454 = vmatpush.msrb.mxu1 %v1381_v3  ;;  %v2063_v3 = vand.u32 4294901760, %v1631_v36  ;;  %v565_v34 = vand.u32 4294901760, %v564_v59 }
  0x47   :  { %497 = vmatpush.msrb.mxu2 %v1556_v12  ;;  %560 = vmatpush.msrb.mxu3 %v559_v62  ;;  %v582_v59 = vsub.f32 %v1648_v44, %v2065_v0  ;;  %v1712_v0 = vsub.f32 %v132_v16, %v1688_v32  ;;  %v1725_v16 = vsub.f32 %v118_v22, %v1698_v6 }
  0x48   :  { %407 = vmatpush.msrb.mxu0 %v2062_v20  ;;  %456 = vmatpush.msrb.mxu1 %v1383_v4  ;;  %v576_v19 = vsub.f32 %v1631_v36, %v2063_v3  ;;  %v571_v4 = vand.u32 4294901760, %v570_v61  ;;  %v117_v20 = vld [vmem:[#allocation8 + $0x8] sm:$0xff]  ;;  %v2067_v61 = vand.u32 4294901760, %v1660_v2  ;;  %v116_v3 = vld [vmem:[#allocation8] sm:$0xff] }
  0x49   :  { %499 = vmatpush.msrb.mxu2 %v1569_v7  ;;  %566 = vmatpush.msrb.mxu3 %v565_v34  ;;  %v1714_v15 = vand.u32 4294901760, %v117_v20  ;;  %v1730_v46 = vand.u32 4294901760, %v116_v3 }
  0x4a   :  { %411 = vmatpush.msrb.mxu0 %v2064_v21  ;;  %458 = vmatpush.msrb.mxu1 %v1385_v5  ;;  %v577_v5 = vand.u32 4294901760, %v576_v19  ;;  %v588_v62 = vsub.f32 %v1660_v2, %v2067_v61  ;;  %v599_v21 = vand.u32 4294901760, %v1686_v42  ;;  %v2069_v19 = vand.u32 4294901760, %v1673_v48 }
  0x4b   :  { %501 = vmatpush.msrb.mxu2 %v1582_v51  ;;  %572 = vmatpush.msrb.mxu3 %v571_v4  ;;  %v2070_v61 = vand.u32 4294901760, %v1474_v52  ;;  %v1738_v22 = vsub.f32 %v117_v20, %v1714_v15  ;;  %v2071_v52 = vand.u32 4294901760, %v1479_v53  ;;  %v1752_v53 = vsub.f32 %v116_v3, %v1730_v46 }
  0x4c   :  { %415 = vmatpush.msrb.mxu0 %v2066_v29  ;;  %460 = vmatpush.msrb.mxu1 %v1387_v9  ;;  %v583_v9 = vand.u32 4294901760, %v582_v59  ;;  %v594_v34 = vsub.f32 %v1673_v48, %v2069_v19  ;;  %v605_v29 = vand.u32 4294901760, %v1701_v14  ;;  %v600_v4 = vsub.f32 %v1686_v42, %v599_v21 }
  0x4d   :  { %503 = vmatpush.msrb.mxu2 %v1589_v60  ;;  %578 = vmatpush.msrb.mxu3 %v577_v5  ;;  %v183_v59 = vand.u32 4294901760, %v1712_v0  ;;  %v2072_v19 = vand.u32 4294901760, %v1498_v1  ;;  %v2074_v3 = vand.u32 4294901760, %v1526_v39  ;;  %v2076_v39 = vand.u32 4294901760, %v1546_v55 }
  0x4e   :  { %419 = vmatpush.msrb.mxu0 %v2068_v40  ;;  %462 = vmatpush.msrb.mxu1 %v1389_v10  ;;  %v589_v10 = vand.u32 4294901760, %v588_v62  ;;  %v595_v5 = vand.u32 4294901760, %v594_v34  ;;  %v606_v62 = vsub.f32 %v1701_v14, %v605_v29  ;;  %v611_v40 = vand.u32 4294901760, %v1725_v16 }
  0x4f   :  { %505 = vmatpush.msrb.mxu2 %v1604_v27  ;;  %584 = vmatpush.msrb.mxu3 %v583_v9  ;;  %v184_v20 = vsub.f32 %v1712_v0, %v183_v59  ;;  %v617_v9 = vand.u32 4294901760, %v1738_v22 }
  0x50   :  { %423 = vmatpush.msrb.mxu0 %v2070_v61  ;;  %464 = vmatpush.msrb.mxu1 %v1391_v11  ;;  %v115_v11 = vld [vmem:[#allocation2] sm:$0x3]  ;;  %v2073_v61 = vand.u32 4294901760, %v1512_v26  ;;  %v612_v1 = vsub.f32 %v1725_v16, %v611_v40 }
  0x51   :  { %507 = vmatpush.msrb.mxu2 %v1625_v37  ;;  %590 = vmatpush.msrb.mxu3 %v589_v10  ;;  %v1757_v34 = vand.u32 4294901760, %v115_v11  ;;  %v623_v10 = vand.u32 4294901760, %v1752_v53  ;;  %v185_v26 = vand.u32 4294901760, %v184_v20 }
  0x52   :  { %427 = vmatpush.msrb.mxu0 %v2071_v52  ;;  %466 = vmatpush.msrb.mxu1 %v1404_v17  ;;  %v601_v17 = vand.u32 4294901760, %v600_v4  ;;  %v2075_v52 = vand.u32 4294901760, %v1539_v49 }
  0x53   :  { %509 = vmatpush.msrb.mxu2 %v1638_v30  ;;  %596 = vmatpush.msrb.mxu3 %v595_v5  ;;  %v1775_v4 = vsub.f32 %v115_v11, %v1757_v34  ;;  %v624_v5 = vsub.f32 %v1752_v53, %v623_v10 }
  0x54   :  { %431 = vmatpush.msrb.mxu0 %v2072_v19  ;;  %468 = vmatpush.msrb.mxu1 %v1420_v25  ;;  %v607_v25 = vand.u32 4294901760, %v606_v62 }
  0x55   :  { %511 = vmatpush.msrb.mxu2 %v1650_v13  ;;  %602 = vmatpush.msrb.mxu3 %v601_v17  ;;  %v524_v11 = vand.u32 4294901760, %v1775_v4 }
  0x56   :  { %435 = vmatpush.msrb.mxu0 %v2073_v61  ;;  %470 = vmatpush.msrb.mxu1 %v1424_v28  ;;  %v618_v28 = vsub.f32 %v1738_v22, %v617_v9 }
  0x57   :  { %513 = vmatpush.msrb.mxu2 %v1662_v45  ;;  %608 = vmatpush.msrb.mxu3 %v607_v25 }
  0x58   :  { %439 = vmatpush.msrb.mxu0 %v2074_v3  ;;  %472 = vmatpush.msrb.mxu1 %v1442_v35  ;;  %v613_v35 = vand.u32 4294901760, %v612_v1  ;;  %v619_v49 = vand.u32 4294901760, %v618_v28 }
  0x59   :  { %515 = vmatpush.msrb.mxu2 %v1675_v47  ;;  %186 = vmatmul.f32.vlgmr.msra.gmra.mxu0 %v185_v26 }
  0x5a   :  { %443 = vmatpush.msrb.mxu0 %v2075_v52  ;;  %474 = vmatpush.msrb.mxu1 %v1454_v41  ;;  %v625_v41 = vand.u32 4294901760, %v624_v5 }
  0x5b   :  { %517 = vmatpush.msrb.mxu2 %v1698_v6  ;;  %614 = vmatpush.msrb.mxu3 %v613_v35 }
  0x5c   :  { %447 = vmatpush.msrb.mxu0 %v2076_v39  ;;  %476 = vmatpush.msrb.mxu1 %v1470_v50  ;;  %v525_v50 = vsub.f32 %v1775_v4, %v524_v11 }
  0x5d   :  { %519 = vmatpush.msrb.mxu2 %v1714_v15  ;;  %620 = vmatpush.msrb.mxu3 %v619_v49 }
  0x5e   :  { %634 = vmatpush.msra.mxu0 %v1534_v43  ;;  %478 = vmatpush.msrb.mxu1 %v1485_v57  ;;  %v2077_v57 = vand.u32 4294901760, %v1534_v43  ;;  %v526_v55 = vand.u32 4294901760, %v525_v50  ;;  %v2080_v43 = vand.u32 4294901760, %v1567_v38 }
  0x5f   :  { %341 = vmatmul.f32.vlgmr.msra.gmra.mxu2 %v1712_v0  ;;  %380 = vmatmul.f32.vlgmr.msra.gmra.mxu3 %v183_v59  ;;  %v2079_v0 = vld [vmem:[#allocation19_spill] sm:$0xff] }
  0x60   :  { %637 = vmatpush.msra.mxu0 %v1549_v56  ;;  %480 = vmatpush.msrb.mxu1 %v1494_v63  ;;  %v2078_v63 = vand.u32 4294901760, %v1549_v56 }
  0x61   :  { %521 = vmatpush.msrb.mxu2 %v1730_v46  ;;  %626 = vmatpush.msrb.mxu3 %v625_v41 }
  0x62   :  { %640 = vmatpush.msra.mxu0 %v1567_v38  ;;  %482 = vmatpush.msrb.mxu1 %v1509_v18  ;;  %v2081_v18 = vand.u32 4294901760, %v1580_v58  ;;  %v2084_v38 = vand.u32 4294901760, %v1618_v23 }
  0x63   :  { %728 = vmatpush.msra.mxu2 %v2077_v57  ;;  %287 = vmatmul.f32.vlgmr.msra.gmra.mxu1 %v1688_v32 }
  0x64   :  { %643 = vmatpush.msra.mxu0 %v1580_v58  ;;  %795 = vmatpush.msra.mxu3 %v1503_v8  ;;  %v2083_v58 = vand.u32 4294901760, %v1612_v24 }
  0x65   :  { %732 = vmatpush.msra.mxu2 %v2078_v63  ;;  %484 = vmatpush.msrb.mxu1 %v2079_v0 }
  0x66   :  { %646 = vmatpush.msra.mxu0 %v1597_v33  ;;  %797 = vmatpush.msra.mxu3 %v1518_v31 }
  0x67   :  { %687 = vmatpush.msra.mxu1 %v1503_v8  ;;  %736 = vmatpush.msra.mxu2 %v2080_v43  ;;  %v2082_v8 = vand.u32 4294901760, %v1597_v33 }
  0x68   :  { %527 = vmatmul.f32.vlgmr.msrb.gmra.mxu2 %v526_v55  ;;  %649 = vmatpush.msra.mxu0 %v1612_v24  ;;  %v2085_v24 = vand.u32 4294901760, %v1631_v36 }
  0x69   :  { %689 = vmatpush.msra.mxu1 %v1518_v31  ;;  %740 = vmatpush.msra.mxu2 %v2081_v18  ;;  %v840_v31 = vld [vmem:[#allocation11 + $0x40] sm:$0x7] }
  0x6a   :  { %799 = vmatpush.msra.mxu3 %v1541_v54  ;;  %449 = vmatmul.f32.vlgmr.msrb.gmra.mxu0 %v1688_v32  ;;  %v847_v33 = vsel %vm845_vm0, %v840_v31, 0 }
  0x6b   :  { %628 = vmatmul.f32.vlgmr.msrb.gmra.mxu3 %v1757_v34  ;;  %652 = vmatpush.msra.mxu0 %v1618_v23  ;;  %v1841_v56 = vand.u32 4294901760, %v847_v33  ;;  %v2086_v23 = vand.u32 4294901760, %v1648_v44 }
  0x6c   :  { %691 = vmatpush.msra.mxu1 %v1541_v54  ;;  %744 = vmatpush.msra.mxu2 %v2082_v8  ;;  %v839_v54 = vld [vmem:[#allocation11 + $0x38] sm:$0xff] }
  0x6d   :  { %801 = vmatpush.msra.mxu3 %v1556_v12  ;;  %486 = vmatmul.f32.vlgmr.msrb.gmra.mxu1 %v1688_v32  ;;  %v2088_v32 = vand.u32 4294901760, %v1673_v48 }
  0x6e   :  { %655 = vmatpush.msra.mxu0 %v1631_v36  ;;  %693 = vmatpush.msra.mxu1 %v1556_v12  ;;  %v2087_v12 = vand.u32 4294901760, %v1660_v2  ;;  %v1856_v36 = vsub.f32 %v847_v33, %v1841_v56 }
  0x6f   :  { %748 = vmatpush.msra.mxu2 %v2083_v58  ;;  %803 = vmatpush.msra.mxu3 %v1569_v7 }
  0x70   :  { %658 = vmatpush.msra.mxu0 %v1648_v44  ;;  %695 = vmatpush.msra.mxu1 %v1569_v7  ;;  %v1848_v7 = vand.u32 4294901760, %v839_v54 }
  0x71   :  { %752 = vmatpush.msra.mxu2 %v2084_v38  ;;  %805 = vmatpush.msra.mxu3 %v1582_v51 }
  0x72   :  { %661 = vmatpush.msra.mxu0 %v1660_v2  ;;  %697 = vmatpush.msra.mxu1 %v1582_v51  ;;  %v838_v51 = vld [vmem:[#allocation11 + $0x30] sm:$0xff]  ;;  %v836_v2 = vld [vmem:[#allocation11 + $0x20] sm:$0xff] }
  0x73   :  { %756 = vmatpush.msra.mxu2 %v2085_v24  ;;  %807 = vmatpush.msra.mxu3 %v1589_v60  ;;  %v1860_v44 = vand.u32 4294901760, %v838_v51  ;;  %v1878_v62 = vand.u32 4294901760, %v836_v2 }
  0x74   :  { %664 = vmatpush.msra.mxu0 %v1673_v48  ;;  %699 = vmatpush.msra.mxu1 %v1589_v60  ;;  %v837_v60 = vld [vmem:[#allocation11 + $0x28] sm:$0xff]  ;;  %v835_v48 = vld [vmem:[#allocation11 + $0x18] sm:$0xff] }
  0x75   :  { %760 = vmatpush.msra.mxu2 %v2086_v23  ;;  %809 = vmatpush.msra.mxu3 %v1604_v27  ;;  %v1870_v59 = vand.u32 4294901760, %v837_v60  ;;  %v1881_v19 = vsub.f32 %v838_v51, %v1860_v44  ;;  %v1906_v20 = vsub.f32 %v836_v2, %v1878_v62 }
  0x76   :  { %667 = vmatpush.msra.mxu0 %v1686_v42  ;;  %701 = vmatpush.msra.mxu1 %v1604_v27  ;;  %v1866_v27 = vsub.f32 %v839_v54, %v1848_v7  ;;  %v834_v42 = vld [vmem:[#allocation11 + $0x10] sm:$0xff] }
  0x77   :  { %764 = vmatpush.msra.mxu2 %v2087_v12  ;;  %811 = vmatpush.msra.mxu3 %v1625_v37  ;;  %v1903_v17 = vand.u32 4294901760, %v834_v42  ;;  %v916_v1 = vand.u32 4294901760, %v1906_v20 }
  0x78   :  { %670 = vmatpush.msra.mxu0 %v1701_v14  ;;  %703 = vmatpush.msra.mxu1 %v1625_v37  ;;  %v892_v37 = vand.u32 4294901760, %v1856_v36 }
  0x79   :  { %768 = vmatpush.msra.mxu2 %v2088_v32  ;;  %813 = vmatpush.msra.mxu3 %v1638_v30 }
  0x7a   :  { %673 = vmatpush.msra.mxu0 %v1725_v16  ;;  %705 = vmatpush.msra.mxu1 %v1638_v30  ;;  %v898_v30 = vand.u32 4294901760, %v1866_v27  ;;  %v893_v14 = vsub.f32 %v1856_v36, %v892_v37 }
  0x7b   :  { %772 = vmatpush.msra.mxu2 %v599_v21  ;;  %815 = vmatpush.msra.mxu3 %v1650_v13  ;;  %v1889_v21 = vand.u32 4294901760, %v835_v48 }
  0x7c   :  { %676 = vmatpush.msra.mxu0 %v1738_v22  ;;  %707 = vmatpush.msra.mxu1 %v1650_v13  ;;  %v1892_v13 = vsub.f32 %v837_v60, %v1870_v59  ;;  %v899_v16 = vsub.f32 %v1866_v27, %v898_v30  ;;  %v894_v22 = vand.u32 4294901760, %v893_v14 }
  0x7d   :  { %776 = vmatpush.msra.mxu2 %v605_v29  ;;  %817 = vmatpush.msra.mxu3 %v1662_v45  ;;  %v833_v29 = vld [vmem:[#allocation11 + $0x8] sm:$0xff]  ;;  %v1920_v25 = vsub.f32 %v835_v48, %v1889_v21 }
  0x7e   :  { %679 = vmatpush.msra.mxu0 %v1752_v53  ;;  %709 = vmatpush.msra.mxu1 %v1662_v45  ;;  %v904_v45 = vand.u32 4294901760, %v1881_v19  ;;  %v1917_v61 = vand.u32 4294901760, %v833_v29  ;;  %v1934_v53 = vsub.f32 %v834_v42, %v1903_v17 }
  0x7f   :  { %780 = vmatpush.msra.mxu2 %v611_v40  ;;  %819 = vmatpush.msra.mxu3 %v1675_v47  ;;  %v832_v40 = vld [vmem:[#allocation11] sm:$0xff]  ;;  %v922_v26 = vand.u32 4294901760, %v1920_v25 }
  0x80   :  { %682 = vmatmul.f32.vlgmr.msra.gmra.mxu0 %v1775_v4  ;;  %711 = vmatpush.msra.mxu1 %v1675_v47  ;;  %v910_v47 = vand.u32 4294901760, %v1892_v13  ;;  %v1931_v3 = vand.u32 4294901760, %v832_v40  ;;  %v1945_v28 = vsub.f32 %v833_v29, %v1917_v61  ;;  %v928_v35 = vand.u32 4294901760, %v1934_v53 }
  0x81   :  { %784 = vmatpush.msra.mxu2 %v617_v9  ;;  %821 = vmatpush.msra.mxu3 %v1698_v6  ;;  %v831_v9 = vld [vmem:[#allocation7] sm:$0x3]  ;;  %v923_v49 = vsub.f32 %v1920_v25, %v922_v26 }
  0x82   :  { %713 = vmatpush.msra.mxu1 %v1698_v6  ;;  %857 = vmatpush.msrb.mxu0 %v1841_v56  ;;  %v905_v6 = vsub.f32 %v1881_v19, %v904_v45  ;;  %v843_v52 = vsel %vm841_vm1, %v831_v9, 0  ;;  %v1956_v39 = vsub.f32 %v832_v40, %v1931_v3  ;;  %v929_v50 = vsub.f32 %v1934_v53, %v928_v35 }
  0x83   :  { %788 = vmatpush.msra.mxu2 %v623_v10  ;;  %823 = vmatpush.msra.mxu3 %v1714_v15  ;;  %v900_v10 = vand.u32 4294901760, %v899_v16  ;;  %v1960_v4 = vand.u32 4294901760, %v843_v52  ;;  %v924_v55 = vand.u32 4294901760, %v923_v49 }
  0x84   :  { %790 = vmatmul.f32.vlgmr.msra.gmra.mxu2 %v1757_v34  ;;  %715 = vmatpush.msra.mxu1 %v1714_v15  ;;  %v911_v15 = vsub.f32 %v1892_v13, %v910_v47  ;;  %v940_v57 = vand.u32 4294901760, %v1956_v39  ;;  %v930_v43 = vand.u32 4294901760, %v929_v50 }
  0x85   :  { %825 = vmatpush.msra.mxu3 %v1730_v46  ;;  %859 = vmatpush.msrb.mxu0 %v1848_v7  ;;  %v875_v63 = vsub.f32 %v843_v52, %v1960_v4 }
  0x86   :  { %827 = vmatmul.f32.vlgmr.msra.gmra.mxu3 %v1757_v34  ;;  %717 = vmatpush.msra.mxu1 %v1730_v46  ;;  %v906_v34 = vand.u32 4294901760, %v905_v6  ;;  %v917_v46 = vsub.f32 %v1906_v20, %v916_v1  ;;  %v912_v5 = vand.u32 4294901760, %v911_v15  ;;  %v941_v18 = vsub.f32 %v1956_v39, %v940_v57  ;;  %v1135_v6 = vld [vmem:[%s2032_s6] ss:$0 sm:$0xff] }
  0x87   :  { %721 = vmatmul.f32.vlgmr.msra.gmra.mxu1 %v524_v11  ;;  %861 = vmatpush.msrb.mxu0 %v1860_v44  ;;  %v934_v11 = vand.u32 4294901760, %v1945_v28  ;;  %v876_v8 = vand.u32 4294901760, %v875_v63 }
  0x88   :  { %895 = vmatpush.msrb.mxu1 %v894_v22  ;;  %958 = vmatpush.msrb.mxu2 %v1856_v36  ;;  %v918_v41 = vand.u32 4294901760, %v917_v46  ;;  %v942_v58 = vand.u32 4294901760, %v941_v18 }
  0x89   :  { %863 = vmatpush.msrb.mxu0 %v1870_v59  ;;  %997 = vmatpush.msrb.mxu3 %v1841_v56  ;;  %v935_v0 = vsub.f32 %v1945_v28, %v934_v11  ;;  %v877_v33 = vsub.f32 %v875_v63, %v876_v8 }
  0x8a   :  { %901 = vmatpush.msrb.mxu1 %v900_v10  ;;  %961 = vmatpush.msrb.mxu2 %v1866_v27 }
  0x8b   :  { %865 = vmatpush.msrb.mxu0 %v1878_v62  ;;  %999 = vmatpush.msrb.mxu3 %v1848_v7  ;;  %v936_v31 = vand.u32 4294901760, %v935_v0  ;;  %v878_v38 = vand.u32 4294901760, %v877_v33 }
  0x8c   :  { %907 = vmatpush.msrb.mxu1 %v906_v34  ;;  %964 = vmatpush.msrb.mxu2 %v1881_v19 }
  0x8d   :  { %867 = vmatpush.msrb.mxu0 %v1889_v21  ;;  %1001 = vmatpush.msrb.mxu3 %v1860_v44 }
  0x8e   :  { %913 = vmatpush.msrb.mxu1 %v912_v5  ;;  %967 = vmatpush.msrb.mxu2 %v1892_v13 }
  0x8f   :  { %869 = vmatpush.msrb.mxu0 %v1903_v17  ;;  %1003 = vmatpush.msrb.mxu3 %v1870_v59 }
  0x90   :  { %919 = vmatpush.msrb.mxu1 %v918_v41  ;;  %970 = vmatpush.msrb.mxu2 %v1906_v20 }
  0x91   :  { %871 = vmatpush.msrb.mxu0 %v1917_v61  ;;  %1005 = vmatpush.msrb.mxu3 %v1878_v62 }
  0x92   :  { %925 = vmatpush.msrb.mxu1 %v924_v55  ;;  %973 = vmatpush.msrb.mxu2 %v1920_v25 }
  0x93   :  { %873 = vmatpush.msrb.mxu0 %v1931_v3  ;;  %1007 = vmatpush.msrb.mxu3 %v1889_v21 }
  0x94   :  { %931 = vmatpush.msrb.mxu1 %v930_v43  ;;  %976 = vmatpush.msrb.mxu2 %v1934_v53 }
  0x95   :  { %1031 = vmatpush.msra.mxu0 %v892_v37  ;;  %1009 = vmatpush.msrb.mxu3 %v1903_v17 }
  0x96   :  { %937 = vmatpush.msrb.mxu1 %v936_v31  ;;  %979 = vmatpush.msrb.mxu2 %v1945_v28 }
  0x97   :  { %1035 = vmatpush.msra.mxu0 %v898_v30  ;;  %1011 = vmatpush.msrb.mxu3 %v1917_v61 }
  0x98   :  { %943 = vmatpush.msrb.mxu1 %v942_v58  ;;  %982 = vmatpush.msrb.mxu2 %v1956_v39 }
  0x99   :  { %1039 = vmatpush.msra.mxu0 %v904_v45  ;;  %985 = vmatmul.f32.vlgmr.msrb.gmra.mxu2 %v875_v63 }
  0x9a   :  { %1077 = vmatpush.msra.mxu1 %v1841_v56  ;;  %1013 = vmatpush.msrb.mxu3 %v1931_v3 }
  0x9b   :  { %1043 = vmatpush.msra.mxu0 %v910_v47  ;;  %1017 = vmatmul.f32.vlgmr.msrb.gmra.mxu3 %v876_v8 }
  0x9c   :  { %1079 = vmatpush.msra.mxu1 %v1848_v7  ;;  %879 = vmatmul.f32.vlgmr.msrb.gmra.mxu0 %v878_v38 }
  0x9d   :  { %1047 = vmatpush.msra.mxu0 %v916_v1  ;;  %945 = vmatmul.f32.vlgmr.msrb.gmra.mxu1 %v1960_v4 }
  0x9e   :  { %1081 = vmatpush.msra.mxu1 %v1860_v44 }
  0x9f   :  { %1051 = vmatpush.msra.mxu0 %v922_v26 }
  0xa0   :  { %1083 = vmatpush.msra.mxu1 %v1870_v59 }
  0xa1   :  { %1055 = vmatpush.msra.mxu0 %v928_v35 }
  0xa2   :  { %1085 = vmatpush.msra.mxu1 %v1878_v62 }
  0xa3   :  { %1059 = vmatpush.msra.mxu0 %v934_v11 }
  0xa4   :  { %1087 = vmatpush.msra.mxu1 %v1889_v21 }
  0xa5   :  { %1063 = vmatpush.msra.mxu0 %v940_v57 }
  0xa6   :  { %1089 = vmatpush.msra.mxu1 %v1903_v17  ;;  %1065 = vmatmul.f32.vlgmr.msra.gmra.mxu0 %v1960_v4 }
  0xa8   :  { %1091 = vmatpush.msra.mxu1 %v1917_v61 }
  0xaa   :  { %1093 = vmatpush.msra.mxu1 %v1931_v3 }
  0xab   :  { %1095 = vmatmul.f32.vlgmr.msra.gmra.mxu1 %v1960_v4 }
  0xd6   :  { %v187_v54 = vpop.f32.mrf.mxu0 }
  0xe0   :  { %v288_v24 = vpop.f32.mrf.mxu1 }
  0xe1   :  { %v289_v23 = vadd.f32 %v288_v24, %v187_v54 }
  0xe2   :  { %v342_v56 = vpop.f32.mrf.mxu2  ;;  %v381_v7 = vpop.f32.mrf.mxu3 }
  0xe3   :  { %v343_v51 = vadd.f32 %v342_v56, %v289_v23 }
  0xe5   :  { %v382_v60 = vadd.f32 %v381_v7, %v343_v51 }
  0xe7   :  { %v450_v12 = vpop.f32.mrf.mxu0 }
  0xe8   :  { %v451_v27 = vadd.f32 %v450_v12, %v382_v60 }
  0xea   :  { %v487_v36 = vpop.f32.mrf.mxu1 }
  0xeb   :  { %v528_v44 = vpop.f32.mrf.mxu2  ;;  %v488_v37 = vadd.f32 %v487_v36, %v451_v27 }
  0xed   :  { %v529_v19 = vadd.f32 %v528_v44, %v488_v37 }
  0xee   :  { %v629_v32 = vpop.f32.mrf.mxu3 }
  0xef   :  { %v630_v21 = vadd.f32 %v629_v32, %v529_v19 }
  0xfd   :  { %v683_v2 = vpop.f32.mrf.mxu0 }
  0xfe   :  { %v684_v29 = vadd.f32 %v683_v2, %v630_v21 }
 0x104   :  { %v722_v59 = vpop.f32.mrf.mxu1 }
 0x105   :  { %v723_v20 = vadd.f32 %v722_v59, %v684_v29 }
 0x107   :  { %v791_v48 = vpop.f32.mrf.mxu2 }
 0x108   :  { %v792_v47 = vadd.f32 %v791_v48, %v723_v20 }
 0x109   :  { %v828_v62 = vpop.f32.mrf.mxu3 }
 0x10a   :  { %v829_v22 = vadd.f32 %v828_v62, %v792_v47 }
 0x119   :  { %v880_v30 = vpop.f32.mrf.mxu0 }
 0x11a   :  { %v946_v42 = vpop.f32.mrf.mxu1 }
 0x11b   :  { %v947_v13 = vadd.f32 %v946_v42, %v880_v30 }
 0x11c   :  { %v986_v14 = vpop.f32.mrf.mxu2 }
 0x11d   :  { %v987_v45 = vadd.f32 %v986_v14, %v947_v13 }
 0x11e   :  { %v1018_v17 = vpop.f32.mrf.mxu3 }
 0x11f   :  { %v1019_v16 = vadd.f32 %v1018_v17, %v987_v45 }
 0x123   :  { %v1066_v40 = vpop.f32.mrf.mxu0 }
 0x124   :  { %v1067_v61 = vadd.f32 %v1066_v40, %v1019_v16 }
 0x128   :  { %v1096_v25 = vpop.f32.mrf.mxu1 }
 0x129   :  { %v1097_v9 = vadd.f32 %v1096_v25, %v1067_v61 }
 0x12b   :  { %v1099_v1 = vadd.f32 %v1097_v9, %v829_v22 }
 0x12d   :  { %v1104_v3 = vadd.f32 %v1135_v6, %v1099_v1 }
 0x12f   :  { %1105 = vst [vmem:[#allocation13] sm:$0x3] %v1104_v3 }
 0x130   :  { %1116 = dma.vmem_to_hbm [thread:$0]  %s1112_s30, 32, %s1114_s10, [#allocation4]  }
 0x131   :  { %1312 = dma.done.wait [#allocation4], 32  }
 0x132   :  { %1313 = vsyncadd [#allocation4], 4294967264 }
 0x133   :  { %1121 = vsyncpa [#allocation3], 1 }
 0x134   :  { %1122 = vsyncpa [#allocation6], 1 }
 0x135   :  { %1123 = vsyncpa [#allocation9], 1 }
 0x136   :  { %1124 = vsyncpa [#allocation12], 1 }
 0x137   :  { %1125 = vsyncpa [#allocation4], 1 }

</bundles_post_ra>
